<compile_context>
chip_gen: v7x
topology: tpu7x:2x2x1
jax: 0.10.0
libtpu: 0.0.40
codegen_flags: <defaults>
</compile_context>

<pallas_src>
import functools

import numpy as np
import jax
import jax.numpy as jnp
from jax.experimental import pallas as pl
from jax.experimental.pallas import tpu as pltpu


def _round_up(a, b):
    return -(-a // b) * b


def _embed_kernel(x_ref, w_ref, o_ref):
    # x_ref: VMEM (TM, D_aug) bf16 -- flattened (graph, node) rows; last
    #                                 column is the row-validity flag.
    # w_ref: VMEM (D_aug, T)  f32  -- [Linear weight^T ; bias]
    # o_ref: VMEM (TM, T)     f32
    #
    # Single MXU matmul does: x @ W^T + valid * bias. Invalid / padded rows
    # are all-zero (including the validity column), so their output is
    # exactly 0 -- this implements `out2[i, len(g):, :] = 0`.
    x = x_ref[...].astype(jnp.float32)   # free VPU upcast; keeps f32 Linear numerics
    o_ref[...] = jnp.dot(x, w_ref[...], preferred_element_type=jnp.float32)


def _pick_tile(M, D_aug, T, tile_m):
    """Row-tile size: multiple of 32, VMEM-budgeted, >=2 grid steps when M allows."""
    d_pad = _round_up(D_aug, 128)              # lane padding in VMEM
    t_pad = _round_up(T, 128)
    # x triple-buffered bf16 + out double-buffered f32, bytes per row in VMEM.
    bytes_per_row = d_pad * 2 * 3 + t_pad * 4 * 2
    vmem_budget = 20 * 1024 * 1024             # safe on v7x (64 MiB phys / 32 MiB scoped)
    cap_vmem = max(32, (vmem_budget // bytes_per_row) // 32 * 32)
    cap_split = _round_up(pl.cdiv(M, 2), 32)   # keep >=2 tiles for v7x's two TensorCores
    tile = max(32, min(int(tile_m), cap_vmem, cap_split))
    return _round_up(tile, 32)


@functools.partial(jax.jit, static_argnames=("tile_m",))
def _embed_call(x_aug, w_aug, *, tile_m):
    B, N, D_aug = x_aug.shape
    T = w_aug.shape[1]
    M = B * N
    n_tiles = pl.cdiv(M, tile_m)
    M_pad = n_tiles * tile_m

    x = x_aug.reshape(M, D_aug)                 # free (row-major) reshape
    if M_pad != M:
        # Padded rows are all-zero -> kernel output for them is exactly 0.
        x = jnp.pad(x, ((0, M_pad - M), (0, 0)))

    x_spec_kwargs = {}
    if n_tiles >= 3:
        # Compute per tile is tiny; a 3-deep buffer hides exposed DMA latency.
        x_spec_kwargs["pipeline_mode"] = pl.Buffered(3)

    grid_spec = pl.GridSpec(
        grid=(n_tiles,),
        in_specs=[
            pl.BlockSpec((tile_m, D_aug), lambda i: (i, 0), **x_spec_kwargs),
            pl.BlockSpec((D_aug, T), lambda i: (0, 0)),     # resident weights+bias
        ],
        out_specs=pl.BlockSpec((tile_m, T), lambda i: (i, 0)),
    )

    cost = pl.CostEstimate(
        flops=2 * M_pad * D_aug * T,
        transcendentals=0,
        bytes_accessed=(M_pad * D_aug * 2       # x (bf16), dominant stream
                        + D_aug * T * 4         # w_aug (f32, read once)
                        + M_pad * T * 4),       # output (f32)
    )

    out = pl.pallas_call(
        _embed_kernel,
        out_shape=jax.ShapeDtypeStruct((M_pad, T), jnp.float32),
        grid_spec=grid_spec,
        compiler_params=pltpu.CompilerParams(
            dimension_semantics=("parallel",),
            vmem_limit_bytes=32 * 1024 * 1024),
        cost_estimate=cost,
    )(x, w_aug)

    if M_pad != M:
        out = out[:M]
    return out.reshape(B, N, T)


def graph_embedder_forward(x_aug, w_aug, *, tile_m=1024):
    """
    x_aug: (B, N, D_in + 1) bf16 -- dense connectivity/node-data rows; the last
           column is the row-validity flag (1.0 for node rows < len(graph)).
           Invalid rows must be all-zero (build_pre_output guarantees this).
    w_aug: (D_in + 1, T) f32     -- [torch Linear weight^T ; bias].
    returns (B, N, T) float32    -- Linear(pre_out) with invalid rows zeroed.
    """
    B, N, D_aug = x_aug.shape
    T = w_aug.shape[1]
    tile = _pick_tile(B * N, D_aug, T, tile_m)
    return _embed_call(x_aug, w_aug, tile_m=tile)


def build_pre_output(adjacencies, lengths, max_nodes):
    """Host-side glue mirroring the Python graph-traversal loop in forward():
    builds the dense (B, this_max_nodes, max_nodes + 1) tensor directly in
    bf16.  The extra last column is the row-validity flag consumed by the
    fused kernel (homogeneous-coordinate bias + `out2[i, len(g):, :] = 0`).
    Rows >= len(graph) are left exactly zero, which the fused kernel relies on.
    """
    # TODO(synk): grammar node_data_index one-hot encoding not replicated
    # (grammar=None path only); it is pure host-side dict lookups anyway.
    B = len(adjacencies)
    this_max_nodes = int(max(int(l) for l in lengths))
    out = np.zeros((B, this_max_nodes, max_nodes + 1), dtype=np.float32)
    for i, (adj, n) in enumerate(zip(adjacencies, lengths)):
        n = min(int(n), max_nodes, this_max_nodes)
        out[i, :n, :n] = adj[:n, :n]        # edge weights (0/1 here) - exact in bf16
        out[i, :n, max_nodes] = 1.0         # validity / homogeneous column
    return jnp.asarray(out.astype(jnp.bfloat16)), this_max_nodes


if __name__ == "__main__":
    key = jax.random.PRNGKey(0)

    # Module hyperparameters (grammar=None -> pre_dim == max_nodes)
    max_nodes = 128
    target_dim = 32
    batch_size = 2

    # Deterministic parameter init (torch Linear: weight (T, D_in), bias (T,))
    kw, kb, kg1, kg2 = jax.random.split(key, 4)
    bound = 1.0 / np.sqrt(max_nodes)
    weight = jax.random.uniform(kw, (target_dim, max_nodes),
                                minval=-bound, maxval=bound, dtype=jnp.float32)
    bias = jax.random.uniform(kb, (target_dim,),
                              minval=-bound, maxval=bound, dtype=jnp.float32)
    # Augmented weight [W^T ; b] so one matmul does matmul + bias + row mask.
    w_aug = jnp.concatenate([weight.T, bias[None, :]], axis=0)   # (D_in+1, T) f32

    # Synthetic "graphs": per-graph node counts + symmetric 0/1 adjacencies
    lengths_np = np.array([10, 16], dtype=np.int32)   # len(g) for each graph
    adjacencies = []
    for kg, n in zip([kg1, kg2], lengths_np):
        a = np.asarray(jax.random.bernoulli(kg, 0.3, (int(n), int(n))),
                       dtype=np.float32)
        a = np.triu(a, k=1)
        a = a + a.T                                    # symmetric, no self loops
        adjacencies.append(a)

    pre_out, this_max_nodes = build_pre_output(adjacencies, lengths_np, max_nodes)

    # "all graphs None" early-return path (host-side, trivially)
    all_none = False
    if all_none:
        result = 0.1 * jnp.ones((batch_size, 1, target_dim), dtype=jnp.float32)
    else:
        result = graph_embedder_forward(pre_out, w_aug)
    result = jax.block_until_ready(result)

    # Reference in plain f32: the 0/1 adjacency is exact in bf16 and the
    # weights/bias stay f32, so this matches the f32 PyTorch Linear.  Tolerance
    # allows for the MXU's reduced-precision passes on f32 matmuls.
    x_f32 = pre_out[..., :max_nodes].astype(jnp.float32)
    ref = jnp.einsum("bnd,dt->bnt", x_f32, weight.T) + bias[None, None, :]
    lengths = jnp.asarray(lengths_np, dtype=jnp.int32)
    row_ids = jnp.arange(this_max_nodes)[None, :, None]
    ref = jnp.where(row_ids < lengths[:, None, None], ref, 0.0)
    np.testing.assert_allclose(np.asarray(result), np.asarray(ref),
                               rtol=2e-3, atol=2e-3)

    assert result.shape == (batch_size, this_max_nodes, target_dim)
    print("KERNEL_OK")
</pallas_src>

<mosaic_0001>
module attributes {stable_mosaic.version = 11 : i64} {
  func.func @_embed_kernel(%arg0: i32, %arg1: memref<32x129xbf16, #tpu.memory_space<vmem>>, %arg2: memref<129x32xf32, #tpu.memory_space<vmem>>, %arg3: memref<32x32xf32, #tpu.memory_space<vmem>>) attributes {dimension_semantics = [#tpu.dimension_semantics<parallel>], iteration_bounds = array<i64: 1>, scalar_prefetch = 0 : i64, scratch_operands = 0 : i64, tpu.core_type = #tpu.core_type<tc>, window_params = [{transform_indices = @transform_0, window_bounds = array<i64: 32, 129>}, {pipeline_mode = #tpu.pipeline_mode<synchronous>, transform_indices = @transform_1, window_bounds = array<i64: 129, 32>}, {transform_indices = @transform_2, window_bounds = array<i64: 32, 32>}]} {
    %c0 = arith.constant 0 : index
    %c0_0 = arith.constant 0 : index
    %0 = vector.load %arg1[%c0, %c0_0] : memref<32x129xbf16, #tpu.memory_space<vmem>>, vector<32x129xbf16>
    %1 = arith.extf %0 : vector<32x129xbf16> to vector<32x129xf32>
    %c0_1 = arith.constant 0 : index
    %c0_2 = arith.constant 0 : index
    %2 = vector.load %arg2[%c0_1, %c0_2] : memref<129x32xf32, #tpu.memory_space<vmem>>, vector<129x32xf32>
    %cst = arith.constant dense<0.000000e+00> : vector<32x32xf32>
    %3 = tpu.matmul %1, %2, %cst {dimension_numbers = #tpu.dot_dimension_numbers<[1], [0], [0], [1], [0, 0, 1, 1], [], []>} : vector<32x129xf32>, vector<129x32xf32>, vector<32x32xf32> -> vector<32x32xf32>
    %c0_3 = arith.constant 0 : index
    %c0_4 = arith.constant 0 : index
    %4 = vector.load %arg3[%c0_3, %c0_4] : memref<32x32xf32, #tpu.memory_space<vmem>>, vector<32x32xf32>
    tpu.vector_store %arg3[%c0_3, %c0_4], %3 {strides = array<i32>} : memref<32x32xf32, #tpu.memory_space<vmem>>, vector<32x32xf32>,
    return
  }
  func.func @transform_0(%arg0: i32) -> (i32, i32) {
    %c0_i32 = arith.constant 0 : i32
    %c0_i32_0 = arith.constant 0 : i32
    return %arg0, %c0_i32 : i32, i32
  }
  func.func @transform_1(%arg0: i32) -> (i32, i32) {
    %c0_i32 = arith.constant 0 : i32
    %c0_i32_0 = arith.constant 0 : i32
    %c0_i32_1 = arith.constant 0 : i32
    return %c0_i32, %c0_i32_0 : i32, i32
  }
  func.func @transform_2(%arg0: i32) -> (i32, i32) {
    %c0_i32 = arith.constant 0 : i32
    %c0_i32_0 = arith.constant 0 : i32
    return %arg0, %c0_i32 : i32, i32
  }
}

</mosaic_0001>

<bundles_post_ra>
// kernel: _embed_call.1
= control target key start
LH: loop header
LB: loop body
LE: loop exit
PB: predicated region body
PF: predicated region fallthrough
CT: control target
= control target key end

     0   :  { %v240_v3 = vmov 0.0|0.0   ;;  %vm41_vm0 = vcmask 7168   ;;  %s343_s0 = inlined_call_operand.vmem [shape: bf16[32,129], index: 0, kind: input, shape index: {}]   ;;  %s344_s1 = inlined_call_operand.vmem [shape: f32[129,32], index: 1, kind: input, shape index: {}]   ;;  %s345_s2 = inlined_call_operand.hbm [shape: f32[32,32], index: 2, kind: output, shape index: {}]  }
   0x1   :  { %v24_v0 = vld [vmem:[%s344_s1] sm:$0xff]  ;;  %v25_v1 = vld [vmem:[%s344_s1 + $0x8] sm:$0xff]  ;;  %v26_v2 = vld [vmem:[%s344_s1 + $0x10] sm:$0xff]  ;;  %169 = vmatprep.subr.bf16.mxu0 %v240_v3  ;;  %193 = vmatprep.subr.bf16.mxu1 %v240_v3 }
   0x2   :  { %v170_v4 = vpack.c.bf16 %v25_v1, %v24_v0  ;;  %v27_v5 = vld [vmem:[%s344_s1 + $0x18] sm:$0xff]  ;;  %v28_v7 = vld [vmem:[%s344_s1 + $0x20] sm:$0xff]  ;;  %v29_v8 = vld [vmem:[%s344_s1 + $0x28] sm:$0xff] }
   0x3   :  { %v173_v6 = vpack.c.bf16 %v27_v5, %v26_v2  ;;  %v281_v9 = vld [vmem:[%s343_s0] sm:$0xff]  ;;  %v14_v11 = vld [vmem:[%s343_s0 + $0x10] sm:$0xff]  ;;  %v176_v12 = vpack.c.bf16 %v29_v8, %v28_v7 }
   0x4   :  { %171 = vmatpush1.bf16.msra.mxu0 %v170_v4  ;;  %202 = vmatpush1.bf16.msra.mxu1 %v170_v4  ;;  %v17_v10 = vunpack.c.h.bf16 %v281_v9  ;;  %v21_v13 = vunpack.c.h.bf16 %v14_v11 }
   0x5   :  { %172 = vmatprep.subr.bf16.mxu0 %v240_v3  ;;  %194 = vmatprep.subr.bf16.mxu1 %v240_v3 }
   0x8   :  { %174 = vmatpush1.bf16.msra.mxu0 %v173_v6  ;;  %203 = vmatpush1.bf16.msra.mxu1 %v173_v6 }
   0x9   :  { %7 = vsyncpa [#allocation3], 0  ;;  %175 = vmatprep.subr.bf16.mxu0 %v240_v3  ;;  %195 = vmatprep.subr.bf16.mxu1 %v240_v3  ;;  %v30_v14 = vld [vmem:[%s344_s1 + $0x30] sm:$0xff]  ;;  %v31_v15 = vld [vmem:[%s344_s1 + $0x38] sm:$0xff]  ;;  %v241_v31 = vmov 0.0   ;;  %vm54_vm1 = vcmask 1040384   ;;  %v16_v33 = vunpack.c.l.bf16 %v281_v9  ;;  %v20_v34 = vunpack.c.l.bf16 %v14_v11 }
   0xa   :  { %165 = vmatprep.mubr.msk.f32.mxu0 %vm41_vm0, %v17_v10  ;;  %167 = vmatprep.mubr.msk.f32.mxu1 %vm41_vm0, %v21_v13  ;;  %v179_v16 = vpack.c.bf16 %v31_v15, %v30_v14  ;;  %v32_v17 = vld [vmem:[%s344_s1 + $0x40] sm:$0xff]  ;;  %v33_v18 = vld [vmem:[%s344_s1 + $0x48] sm:$0xff]  ;;  %v34_v20 = vld [vmem:[%s344_s1 + $0x50] sm:$0xff]  ;;  %vm143_vm2 = vcmask 261120  }
   0xb   :  { %v182_v19 = vpack.c.bf16 %v33_v18, %v32_v17  ;;  %v35_v21 = vld [vmem:[%s344_s1 + $0x58] sm:$0xff]  ;;  %v36_v23 = vld [vmem:[%s344_s1 + $0x60] sm:$0xff]  ;;  %v37_v24 = vld [vmem:[%s344_s1 + $0x68] sm:$0xff] }
   0xc   :  { %177 = vmatpush1.bf16.msra.mxu0 %v176_v12  ;;  %204 = vmatpush1.bf16.msra.mxu1 %v176_v12  ;;  %v185_v22 = vpack.c.bf16 %v35_v21, %v34_v20  ;;  %v188_v25 = vpack.c.bf16 %v37_v24, %v36_v23  ;;  %v38_v26 = vld [vmem:[%s344_s1 + $0x70] sm:$0xff]  ;;  %v39_v27 = vld [vmem:[%s344_s1 + $0x78] sm:$0xff]  ;;  %v13_v29 = vld [vmem:[%s343_s0 + $0x8] sm:$0xff] }
   0xd   :  { %178 = vmatprep.subr.bf16.mxu0 %v240_v3  ;;  %196 = vmatprep.subr.bf16.mxu1 %v240_v3  ;;  %v191_v28 = vpack.c.bf16 %v39_v27, %v38_v26  ;;  %v15_v30 = vld [vmem:[%s343_s0 + $0x18] sm:$0xff]  ;;  %v40_v32 = vld [vmem:[%s344_s1 + $0x80] sm:$0x1]  ;;  %v19_v35 = vunpack.c.h.bf16 %v13_v29  ;;  %v18_v37 = vunpack.c.l.bf16 %v13_v29  ;;  %s242_s0 = smov [#allocation2]  }
   0xe   :  { %v23_v36 = vunpack.c.h.bf16 %v15_v30  ;;  %v22_v38 = vunpack.c.l.bf16 %v15_v30  ;;  %s153_s1 = sshll.u32 %s242_s0, 4  ;;  %s154_s1 = int_to_ptr.vmem [resolvable:$true] %s153_s1 }
   0xf   :  { %s216_s23 = scalar_lea.vmem %s154_s1, 512  ;;  %p221_p1 = scmp.lt.s32.totalorder %s154_s1, %s154_s1 }
  0x10   :  { %180 = vmatpush1.bf16.msra.mxu0 %v179_v16  ;;  %205 = vmatpush1.bf16.msra.mxu1 %v179_v16  ;;  %p217_p0 = scmp.ne.s32.totalorder %s154_s1, %s216_s23  ;;  %p222_p2 = scmp.lt.s32.totalorder %s216_s23, %s216_s23 }
  0x11   :  { %181 = vmatprep.subr.bf16.mxu0 %v240_v3  ;;  %197 = vmatprep.subr.bf16.mxu1 %v240_v3 }
  0x12   :  { %p223_p3 = por %p222_p2, %p221_p1 }
  0x14   :  { %183 = vmatpush1.bf16.msra.mxu0 %v182_v19  ;;  %206 = vmatpush1.bf16.msra.mxu1 %v182_v19  ;;  %p224_p4 = pnand %p223_p3, %p217_p0 }
  0x15   :  { %184 = vmatprep.subr.bf16.mxu0 %v240_v3  ;;  %198 = vmatprep.subr.bf16.mxu1 %v240_v3 }
  0x18   :  { %186 = vmatpush1.bf16.msra.mxu0 %v185_v22  ;;  %207 = vmatpush1.bf16.msra.mxu1 %v185_v22 }
  0x19   :  { %187 = vmatprep.subr.bf16.mxu0 %v240_v3  ;;  %199 = vmatprep.subr.bf16.mxu1 %v240_v3 }
  0x1c   :  { %189 = vmatpush1.bf16.msra.mxu0 %v188_v25  ;;  %208 = vmatpush1.bf16.msra.mxu1 %v188_v25 }
  0x1d   :  { %190 = vmatprep.subr.bf16.mxu0 %v240_v3  ;;  %200 = vmatprep.subr.bf16.mxu1 %v240_v3 }
  0x20   :  { %192 = vmatpush1.bf16.msra.mxu0 %v191_v28  ;;  %209 = vmatpush1.bf16.msra.mxu1 %v191_v28 }
  0x21   :  { %90 = vmatprep.subr.mxu0 %v241_v31  ;;  %201 = vmatprep.subr.mxu1 %v241_v31 }
  0x24   :  { %164 = vmatpush1.msk.msra.mxu0 %vm54_vm1, %v40_v32  ;;  %210 = vmatpush1.msk.msra.mxu1 %vm54_vm1, %v40_v32 }
  0x25   :  { %123 = vmatmul.mubr.f32.vlgmr.msra.gmra.mrb[0].mxu0 %v16_v33  ;;  %133 = vmatmul.mubr.f32.vlgmr.msra.gmra.mrb[0].mxu1 %v20_v34 }
  0x26   :  { %166 = vmatprep.mubr.msk.f32.mxu0 %vm41_vm0, %v19_v35  ;;  %168 = vmatprep.mubr.msk.f32.mxu1 %vm41_vm0, %v23_v36 }
  0x29   :  { %128 = vmatmul.mubr.f32.gmra.mrb[2].mxu0 %v18_v37  ;;  %138 = vmatmul.mubr.f32.gmra.mrb[2].mxu1 %v22_v38 }
  0xf8   :  { %v124_v39 = vpop.f32.mrb[0].mxu0  ;;  %v134_v40 = vpop.f32.mrb[0].mxu1 }
  0xf9   :  { %144 = vst.msk [vmem:[#allocation2] sm:$0xff] %vm143_vm2, %v124_v39  ;;  %146 = vst.msk [vmem:[#allocation2 + $0x10] sm:$0xff] %vm143_vm2, %v134_v40  ;;  %v126_v41 = vpop.f32.mrb[1].mxu0  ;;  %v136_v42 = vpop.f32.mrb[1].mxu1 }
  0xfc   :  { %v129_v43 = vpop.f32.mrb[2].mxu0  ;;  %v139_v44 = vpop.f32.mrb[2].mxu1 }
  0xfd   :  { %145 = vst.msk [vmem:[#allocation2 + $0x8] sm:$0xff] %vm143_vm2, %v129_v43  ;;  %147 = vst.msk [vmem:[#allocation2 + $0x18] sm:$0xff] %vm143_vm2, %v139_v44  ;;  %v131_v45 = vpop.f32.mrb[3].mxu0  ;;  %v141_v46 = vpop.f32.mrb[3].mxu1 }
  0xfe   :  { %227 = shalt.err (!%p224_p4)
}
  0xff   :  { %s228_s26 = scalar_lea.hbm %s345_s2, 512 }
 0x100   :  { %p229_p5 = scmp.ne.s32.totalorder %s345_s2, %s228_s26  ;;  %p232_p6 = scmp.lt.u32.totalorder %s228_s26, %s345_s2 }
 0x102   :  { %p234_p7 = pnand %p232_p6, %p229_p5 }
 0x104   :  { %237 = shalt.err (!%p234_p7)
}
 0x105   :  { %s243_s3 = smov 128   ;;  %s244_s4 = smov 8  }
 0x106   :  { %159 = dma.vmem_to_hbm [thread:$0]  %s154_s1, 512, %s345_s2, [#allocation3], %s243_s3, %s243_s3, %s244_s4  }
 0x107   :  { %238 = dma.done.wait [#allocation3], 512  }
 0x108   :  { %239 = vsyncadd [#allocation3], 4294966784 }
 0x109   :  { %163 = vsyncpa [#allocation3], 1 }

</bundles_post_ra>
